<compile_context>
chip_gen: v5e
topology: v5e:2x2
jax: 0.10.0
libtpu: 0.0.40
codegen_flags: <defaults>
</compile_context>

<pallas_src>
import jax
import jax.numpy as jnp
from jax.experimental import pallas as pl
from jax.experimental.pallas import tpu as pltpu

N_IN = 256
N_HIDDEN = 128
N_OUT = 2
N_OUT_PAD = 128          # lane-dense padded fc3 output width
DEFAULT_TILE_B = 512


def _round_up(n, m):
    return ((n + m - 1) // m) * m


def domain_predictor_kernel(x_ref,       # (TILE_B, 256)  f32
                            w2_ref,      # (256, 128)     bf16  (BN-folded)
                            b2_ref,      # (1, 128)       f32   (BN-folded)
                            mask_ref,    # (TILE_B, 128)  f32   dropout mask (0.0 / 2.0)
                            w3_ref,      # (128, 128)     bf16  (zero-padded cols 2..127)
                            b3_ref,      # (1, 128)       f32   (zero-padded)
                            out_ref):    # (TILE_B, 128)  f32
    # fc2 (+ folded BatchNorm): bf16 MXU matmul, f32 accumulation.
    x16 = x_ref[...].astype(jnp.bfloat16)
    h = jnp.dot(x16, w2_ref[...], preferred_element_type=jnp.float32)
    h = h + b2_ref[...]

    # ReLU (f32, VPU)
    h = jnp.maximum(h, 0.0)

    # Dropout p=0.5 (inverted scaling already baked into the mask: 0.0 or 2.0)
    h = h * mask_ref[...]

    # fc3 -> lane-dense 128-wide padded output (real logits live in columns 0..1)
    h16 = h.astype(jnp.bfloat16)
    out_ref[...] = (jnp.dot(h16, w3_ref[...], preferred_element_type=jnp.float32)
                    + b3_ref[...])


def domain_predictor(x, params, dropout_key, tile_b=DEFAULT_TILE_B):
    """x: (B, 256) f32.  params: dict from init_params.  dropout_key: jax PRNG key."""
    B = x.shape[0]

    # Pad batch to a sublane-aligned multiple of the tile size.
    b_pad = _round_up(B, 8)
    tile_b = min(tile_b, b_pad)
    b_pad = _round_up(b_pad, tile_b)
    if b_pad != B:
        x = jnp.pad(x, ((0, b_pad - B), (0, 0)))

    # Inverted-dropout mask, one independent row per (padded) batch element.
    keep = jax.random.bernoulli(dropout_key, p=0.5, shape=(b_pad, N_HIDDEN))
    mask = keep.astype(jnp.float32) * 2.0

    grid = (b_pad // tile_b,)

    cost = pl.CostEstimate(
        flops=2 * b_pad * N_IN * N_HIDDEN + 2 * b_pad * N_HIDDEN * N_OUT_PAD,
        transcendentals=0,
        bytes_accessed=(b_pad * N_IN * 4            # x
                        + b_pad * N_HIDDEN * 4      # dropout mask
                        + b_pad * N_OUT_PAD * 4     # output
                        + (N_IN * N_HIDDEN + N_HIDDEN * N_OUT_PAD) * 2   # bf16 weights
                        + (N_HIDDEN + N_OUT_PAD) * 4))                   # f32 biases

    out = pl.pallas_call(
        domain_predictor_kernel,
        out_shape=jax.ShapeDtypeStruct((b_pad, N_OUT_PAD), jnp.float32),
        grid=grid,
        in_specs=[
            pl.BlockSpec((tile_b, N_IN), lambda i: (i, 0)),            # x
            pl.BlockSpec((N_IN, N_HIDDEN), lambda i: (0, 0)),          # w2 (folded)
            pl.BlockSpec((1, N_HIDDEN), lambda i: (0, 0)),             # b2 (folded)
            pl.BlockSpec((tile_b, N_HIDDEN), lambda i: (i, 0)),        # dropout mask
            pl.BlockSpec((N_HIDDEN, N_OUT_PAD), lambda i: (0, 0)),     # w3 (padded)
            pl.BlockSpec((1, N_OUT_PAD), lambda i: (0, 0)),            # b3 (padded)
        ],
        out_specs=pl.BlockSpec((tile_b, N_OUT_PAD), lambda i: (i, 0)),
        compiler_params=pltpu.CompilerParams(
            dimension_semantics=("parallel",)),
        cost_estimate=cost,
    )(x, params["w2_eff"], params["b2_eff"], mask,
      params["w3_pad"], params["b3_pad"])

    # Drop batch padding and the lane padding of the 2-class logits.
    return out[:B, :N_OUT]


def init_params(key):
    """PyTorch-shaped init, then fold BatchNorm (running stats) into fc2 and
    zero-pad fc3 to a lane-dense 128-wide output.

    fc2:     Linear(256, 128) -> W2 (128, 256), b2 (128,)
    bn2_fc:  BatchNorm1d(128)  (gamma=1, beta=0, running_mean=0, running_var=1)
    fc3:     Linear(128, 2)   -> W3 (2, 128),  b3 (2,)
    (bn_fc3 is defined in __init__ but unused in forward.)
    """
    k1, k2, k3, k4 = jax.random.split(key, 4)

    bound2 = 1.0 / jnp.sqrt(jnp.float32(N_IN))
    w2 = jax.random.uniform(k1, (N_HIDDEN, N_IN), jnp.float32, -bound2, bound2)
    b2 = jax.random.uniform(k2, (N_HIDDEN,), jnp.float32, -bound2, bound2)

    bound3 = 1.0 / jnp.sqrt(jnp.float32(N_HIDDEN))
    w3 = jax.random.uniform(k3, (N_OUT, N_HIDDEN), jnp.float32, -bound3, bound3)
    b3 = jax.random.uniform(k4, (N_OUT,), jnp.float32, -bound3, bound3)

    # BatchNorm1d(128) default buffers/params, running-stats (eval) form.
    gamma = jnp.ones((N_HIDDEN,), jnp.float32)
    beta = jnp.zeros((N_HIDDEN,), jnp.float32)
    running_mean = jnp.zeros((N_HIDDEN,), jnp.float32)
    running_var = jnp.ones((N_HIDDEN,), jnp.float32)
    eps = 1e-5
    bn_scale = gamma / jnp.sqrt(running_var + eps)            # (128,)
    bn_shift = beta - running_mean * bn_scale                 # (128,)

    # Fold bias + BN into fc2:  h = (x @ W2^T + b2) * s + t  ==  x @ (W2^T * s) + (b2*s + t)
    w2_eff = (w2.T * bn_scale[None, :]).astype(jnp.bfloat16)  # (256, 128) bf16
    b2_eff = (b2 * bn_scale + bn_shift).reshape(1, N_HIDDEN)  # (1, 128)   f32

    # fc3, zero-padded to 128 output lanes.
    w3_pad = jnp.zeros((N_HIDDEN, N_OUT_PAD), jnp.float32).at[:, :N_OUT].set(w3.T)
    b3_pad = jnp.zeros((1, N_OUT_PAD), jnp.float32).at[0, :N_OUT].set(b3)

    return {
        "w2_eff": w2_eff,
        "b2_eff": b2_eff,
        "w3_pad": w3_pad.astype(jnp.bfloat16),
        "b3_pad": b3_pad,
    }


if __name__ == "__main__":
    key = jax.random.PRNGKey(0)
    k_params, k_x, k_drop = jax.random.split(key, 3)

    B = 64                                    # small, sublane-aligned batch
    x = jax.random.normal(k_x, (B, N_IN), dtype=jnp.float32)
    params = init_params(k_params)

    out = domain_predictor(x, params, k_drop)
    out = jax.block_until_ready(out)
    assert out.shape == (B, N_OUT) and out.dtype == jnp.float32
    print("KERNEL_OK")
</pallas_src>

<mosaic_0001>
module attributes {stable_mosaic.version = 11 : i64} {
  func.func @domain_predictor_kernel(%arg0: i32, %arg1: memref<64x256xf32, #tpu.memory_space<vmem>>, %arg2: memref<256x128xbf16, #tpu.memory_space<vmem>>, %arg3: memref<1x128xf32, #tpu.memory_space<vmem>>, %arg4: memref<64x128xf32, #tpu.memory_space<vmem>>, %arg5: memref<128x128xbf16, #tpu.memory_space<vmem>>, %arg6: memref<1x128xf32, #tpu.memory_space<vmem>>, %arg7: memref<64x128xf32, #tpu.memory_space<vmem>>) attributes {dimension_semantics = [#tpu.dimension_semantics<parallel>], iteration_bounds = array<i64: 1>, scalar_prefetch = 0 : i64, scratch_operands = 0 : i64, tpu.core_type = #tpu.core_type<tc>, window_params = [{transform_indices = @transform_0, window_bounds = array<i64: 64, 256>}, {pipeline_mode = #tpu.pipeline_mode<synchronous>, transform_indices = @transform_1, window_bounds = array<i64: 256, 128>}, {pipeline_mode = #tpu.pipeline_mode<synchronous>, transform_indices = @transform_2, window_bounds = array<i64: 1, 128>}, {transform_indices = @transform_3, window_bounds = array<i64: 64, 128>}, {pipeline_mode = #tpu.pipeline_mode<synchronous>, transform_indices = @transform_4, window_bounds = array<i64: 128, 128>}, {pipeline_mode = #tpu.pipeline_mode<synchronous>, transform_indices = @transform_5, window_bounds = array<i64: 1, 128>}, {transform_indices = @transform_6, window_bounds = array<i64: 64, 128>}]} {
    %c0 = arith.constant 0 : index
    %c0_0 = arith.constant 0 : index
    %0 = vector.load %arg1[%c0, %c0_0] : memref<64x256xf32, #tpu.memory_space<vmem>>, vector<64x256xf32>
    %1 = arith.truncf %0 : vector<64x256xf32> to vector<64x256xbf16>
    %c0_1 = arith.constant 0 : index
    %c0_2 = arith.constant 0 : index
    %2 = vector.load %arg2[%c0_1, %c0_2] : memref<256x128xbf16, #tpu.memory_space<vmem>>, vector<256x128xbf16>
    %cst = arith.constant dense<0.000000e+00> : vector<64x128xf32>
    %3 = tpu.matmul %1, %2, %cst {dimension_numbers = #tpu.dot_dimension_numbers<[1], [0], [0], [1], [0, 0, 1, 1], [], []>} : vector<64x256xbf16>, vector<256x128xbf16>, vector<64x128xf32> -> vector<64x128xf32>
    %c0_3 = arith.constant 0 : index
    %c0_4 = arith.constant 0 : index
    %4 = vector.load %arg3[%c0_3, %c0_4] : memref<1x128xf32, #tpu.memory_space<vmem>>, vector<1x128xf32>
    %5 = vector.broadcast %4 : vector<1x128xf32> to vector<64x128xf32>
    %6 = arith.addf %3, %5 : vector<64x128xf32>
    %cst_5 = arith.constant 0.000000e+00 : f32
    %7 = vector.broadcast %cst_5 : f32 to vector<64x128xf32>
    %8 = arith.maximumf %6, %7 : vector<64x128xf32>
    %c0_6 = arith.constant 0 : index
    %c0_7 = arith.constant 0 : index
    %9 = vector.load %arg4[%c0_6, %c0_7] : memref<64x128xf32, #tpu.memory_space<vmem>>, vector<64x128xf32>
    %10 = arith.mulf %8, %9 : vector<64x128xf32>
    %11 = arith.truncf %10 : vector<64x128xf32> to vector<64x128xbf16>
    %c0_8 = arith.constant 0 : index
    %c0_9 = arith.constant 0 : index
    %12 = vector.load %arg5[%c0_8, %c0_9] : memref<128x128xbf16, #tpu.memory_space<vmem>>, vector<128x128xbf16>
    %cst_10 = arith.constant dense<0.000000e+00> : vector<64x128xf32>
    %13 = tpu.matmul %11, %12, %cst_10 {dimension_numbers = #tpu.dot_dimension_numbers<[1], [0], [0], [1], [0, 0, 1, 1], [], []>} : vector<64x128xbf16>, vector<128x128xbf16>, vector<64x128xf32> -> vector<64x128xf32>
    %c0_11 = arith.constant 0 : index
    %c0_12 = arith.constant 0 : index
    %14 = vector.load %arg6[%c0_11, %c0_12] : memref<1x128xf32, #tpu.memory_space<vmem>>, vector<1x128xf32>
    %15 = vector.broadcast %14 : vector<1x128xf32> to vector<64x128xf32>
    %16 = arith.addf %13, %15 : vector<64x128xf32>
    %c0_13 = arith.constant 0 : index
    %c0_14 = arith.constant 0 : index
    %17 = vector.load %arg7[%c0_13, %c0_14] : memref<64x128xf32, #tpu.memory_space<vmem>>, vector<64x128xf32>
    tpu.vector_store %arg7[%c0_13, %c0_14], %16 {strides = array<i32>} : memref<64x128xf32, #tpu.memory_space<vmem>>, vector<64x128xf32>,
    return
  }
  func.func @transform_0(%arg0: i32) -> (i32, i32) {
    %c0_i32 = arith.constant 0 : i32
    %c0_i32_0 = arith.constant 0 : i32
    return %arg0, %c0_i32 : i32, i32
  }
  func.func @transform_1(%arg0: i32) -> (i32, i32) {
    %c0_i32 = arith.constant 0 : i32
    %c0_i32_0 = arith.constant 0 : i32
    %c0_i32_1 = arith.constant 0 : i32
    return %c0_i32, %c0_i32_0 : i32, i32
  }
  func.func @transform_2(%arg0: i32) -> (i32, i32) {
    %c0_i32 = arith.constant 0 : i32
    %c0_i32_0 = arith.constant 0 : i32
    %c0_i32_1 = arith.constant 0 : i32
    return %c0_i32, %c0_i32_0 : i32, i32
  }
  func.func @transform_3(%arg0: i32) -> (i32, i32) {
    %c0_i32 = arith.constant 0 : i32
    %c0_i32_0 = arith.constant 0 : i32
    return %arg0, %c0_i32 : i32, i32
  }
  func.func @transform_4(%arg0: i32) -> (i32, i32) {
    %c0_i32 = arith.constant 0 : i32
    %c0_i32_0 = arith.constant 0 : i32
    %c0_i32_1 = arith.constant 0 : i32
    return %c0_i32, %c0_i32_0 : i32, i32
  }
  func.func @transform_5(%arg0: i32) -> (i32, i32) {
    %c0_i32 = arith.constant 0 : i32
    %c0_i32_0 = arith.constant 0 : i32
    %c0_i32_1 = arith.constant 0 : i32
    return %c0_i32, %c0_i32_0 : i32, i32
  }
  func.func @transform_6(%arg0: i32) -> (i32, i32) {
    %c0_i32 = arith.constant 0 : i32
    %c0_i32_0 = arith.constant 0 : i32
    return %arg0, %c0_i32 : i32, i32
  }
}

</mosaic_0001>

<bundles_post_ra>
// kernel: tpu_custom_call.1
= control target key start
LH: loop header
LB: loop body
LE: loop exit
PB: predicated region body
PF: predicated region fallthrough
CT: control target
= control target key end

     0   :  { %11 = vsyncpa [#allocation3], 0  ;;  %s797_s0 = inlined_call_operand.hbm [shape: f32[64,256], index: 0, kind: input, shape index: {}]   ;;  %s798_s1 = inlined_call_operand.hbm [shape: bf16[256,128], index: 1, kind: input, shape index: {}]   ;;  %s799_s2 = inlined_call_operand.vmem [shape: f32[1,128], index: 2, kind: input, shape index: {}]   ;;  %s800_s3 = inlined_call_operand.hbm [shape: f32[64,128], index: 3, kind: input, shape index: {}]   ;;  %s801_s4 = inlined_call_operand.hbm [shape: bf16[128,128], index: 4, kind: input, shape index: {}]   ;;  %s802_s5 = inlined_call_operand.vmem [shape: f32[1,128], index: 5, kind: input, shape index: {}]   ;;  %s803_s6 = inlined_call_operand.hbm [shape: f32[64,128], index: 6, kind: output, shape index: {}]  }
   0x1   :  { %12 = vsyncpa [#allocation6], 0 }
   0x2   :  { %13 = vsyncpa [#allocation9], 0  ;;  %s32_s23 = sshll.u32 %s798_s1, 4  ;;  %s33_s23 = int_to_ptr.hbm [resolvable:$true] %s32_s23 }
   0x3   :  { %14 = vsyncpa [#allocation4], 0  ;;  %s724_s24 = smov [#allocation5]   ;;  %s19_s28 = sshll.u32 %s797_s0, 4  ;;  %s20_s28 = int_to_ptr.hbm [resolvable:$true] %s19_s28 }
   0x4   :  { %s34_s25 = sshll.u32 %s724_s24, 4  ;;  %s725_s29 = smov 64   ;;  %s35_s25 = int_to_ptr.vmem [resolvable:$true] %s34_s25 }
   0x5   :  { %s726_s30 = smov 4   ;;  %s727_s7 = smov [#allocation2]  }
   0x6   :  { %40 = dma.hbm_to_vmem [thread:$0]  %s33_s23, 2048, %s35_s25, [#allocation6], %s725_s29, %s725_s29, %s726_s30  }
   0x7   :  { %s21_s8 = sshll.u32 %s727_s7, 4  ;;  %s728_s9 = smov 256   ;;  %s22_s8 = int_to_ptr.vmem [resolvable:$true] %s21_s8 }
   0x8   :  { %s729_s10 = smov 16   ;;  %s47_s12 = sshll.u32 %s800_s3, 4  ;;  %s48_s12 = int_to_ptr.hbm [resolvable:$true] %s47_s12 }
   0x9   :  { %27 = dma.hbm_to_vmem [thread:$0]  %s20_s28, 2048, %s22_s8, [#allocation3], %s728_s9, %s728_s9, %s729_s10  }
   0xa   :  { %s730_s13 = smov [#allocation7]   ;;  %s60_s16 = sshll.u32 %s801_s4, 4  ;;  %s61_s16 = int_to_ptr.hbm [resolvable:$true] %s60_s16 }
   0xb   :  { %s49_s14 = sshll.u32 %s730_s13, 4  ;;  %s731_s17 = smov 128   ;;  %s50_s14 = int_to_ptr.vmem [resolvable:$true] %s49_s14 }
   0xc   :  { %s732_s18 = smov 8   ;;  %s733_s19 = smov [#allocation8]  }
   0xd   :  { %55 = dma.hbm_to_vmem [thread:$0]  %s48_s12, 1024, %s50_s14, [#allocation6], %s731_s17, %s731_s17, %s732_s18  }
   0xe   :  { %s62_s20 = sshll.u32 %s733_s19, 4  ;;  %s63_s20 = int_to_ptr.vmem [resolvable:$true] %s62_s20 }
   0xf   :  { %68 = dma.hbm_to_vmem [thread:$0]  %s61_s16, 1024, %s63_s20, [#allocation9], %s725_s29, %s725_s29, %s726_s30  }
  0x10   :  { %716 = dma.done.wait [#allocation3], 2048  }
  0x11   :  { %717 = vsyncadd [#allocation3], 4294965248 }
  0x12   :  { %718 = dma.done.wait [#allocation6], 3072  }
  0x13   :  { %719 = vsyncadd [#allocation6], 4294964224 }
  0x14   :  { %720 = dma.done.wait [#allocation9], 1024  }
  0x15   :  { %721 = vsyncadd [#allocation9], 4294966272  ;;  %v558_v0 = vld [vmem:[#allocation5 + $0x38] sm:$0xff]  ;;  %v557_v2 = vld [vmem:[#allocation5 + $0x30] sm:$0xff]  ;;  %s440_s25 = sshll.u32 %s803_s6, 4  ;;  %s441_s25 = int_to_ptr.hbm [resolvable:$true] %s440_s25 }
  0x16   :  { %v566_v1 = vld [vmem:[#allocation5 + $0x78] sm:$0xff]  ;;  %243 = vmatpush.bf16.msra.mxu0 %v558_v0  ;;  %v565_v3 = vld [vmem:[#allocation5 + $0x70] sm:$0xff]  ;;  %575 = vmatpush.bf16.msra.mxu3 %v558_v0  ;;  %v556_v4 = vld [vmem:[#allocation5 + $0x28] sm:$0xff] }
  0x17   :  { %272 = vmatpush.bf16.msra.mxu1 %v566_v1  ;;  %v564_v5 = vld [vmem:[#allocation5 + $0x68] sm:$0xff]  ;;  %v555_v6 = vld [vmem:[#allocation5 + $0x20] sm:$0xff]  ;;  %v554_v8 = vld [vmem:[#allocation5 + $0x18] sm:$0xff] }
  0x18   :  { %v563_v7 = vld [vmem:[#allocation5 + $0x60] sm:$0xff]  ;;  %v562_v9 = vld [vmem:[#allocation5 + $0x58] sm:$0xff]  ;;  %v553_v10 = vld [vmem:[#allocation5 + $0x10] sm:$0xff] }
  0x19   :  { %v561_v11 = vld [vmem:[#allocation5 + $0x50] sm:$0xff]  ;;  %v552_v12 = vld [vmem:[#allocation5 + $0x8] sm:$0xff]  ;;  %v551_v14 = vld [vmem:[#allocation5] sm:$0xff] }
  0x1a   :  { %244 = vmatpush.bf16.msra.mxu0 %v557_v2  ;;  %576 = vmatpush.bf16.msra.mxu3 %v557_v2  ;;  %v560_v13 = vld [vmem:[#allocation5 + $0x48] sm:$0xff]  ;;  %v559_v15 = vld [vmem:[#allocation5 + $0x40] sm:$0xff]  ;;  %v89_v17 = vld [vmem:[#allocation2 + $0x10] sm:$0xff] }
  0x1b   :  { %273 = vmatpush.bf16.msra.mxu1 %v565_v3  ;;  %v87_v16 = vld [vmem:[#allocation2] sm:$0xff]  ;;  %v88_v18 = vld [vmem:[#allocation2 + $0x8] sm:$0xff]  ;;  %v90_v19 = vld [vmem:[#allocation2 + $0x18] sm:$0xff] }
  0x1c   :  { %v91_v20 = vld [vmem:[#allocation2 + $0x20] sm:$0xff]  ;;  %v93_v21 = vld [vmem:[#allocation2 + $0x30] sm:$0xff]  ;;  %v103_v22 = vpack.c.bf16 %v89_v17, %v87_v16  ;;  %v104_v23 = vpack.c.bf16 %v90_v19, %v88_v18  ;;  %v92_v25 = vld [vmem:[#allocation2 + $0x28] sm:$0xff] }
  0x1d   :  { %v105_v24 = vpack.c.bf16 %v93_v21, %v91_v20  ;;  %v94_v26 = vld [vmem:[#allocation2 + $0x38] sm:$0xff]  ;;  %v95_v27 = vld [vmem:[#allocation2 + $0x40] sm:$0xff]  ;;  %v97_v28 = vld [vmem:[#allocation2 + $0x50] sm:$0xff] }
  0x1e   :  { %245 = vmatpush.bf16.msra.mxu0 %v556_v4  ;;  %577 = vmatpush.bf16.msra.mxu3 %v556_v4  ;;  %v106_v29 = vpack.c.bf16 %v94_v26, %v92_v25  ;;  %v107_v30 = vpack.c.bf16 %v97_v28, %v95_v27  ;;  %v574_v31 = vld [vmem:[#allocation8 + $0x38] sm:$0xff]  ;;  %v573_v32 = vld [vmem:[#allocation8 + $0x30] sm:$0xff]  ;;  %v572_v33 = vld [vmem:[#allocation8 + $0x28] sm:$0xff] }
  0x1f   :  { %274 = vmatpush.bf16.msra.mxu1 %v564_v5  ;;  %397 = vmatpush.bf16.msra.mxu2 %v574_v31  ;;  %v96_v34 = vld [vmem:[#allocation2 + $0x48] sm:$0xff]  ;;  %v98_v35 = vld [vmem:[#allocation2 + $0x58] sm:$0xff]  ;;  %v99_v36 = vld [vmem:[#allocation2 + $0x60] sm:$0xff] }
  0x20   :  { %v101_v37 = vld [vmem:[#allocation2 + $0x70] sm:$0xff]  ;;  %v108_v38 = vpack.c.bf16 %v98_v35, %v96_v34  ;;  %v100_v40 = vld [vmem:[#allocation2 + $0x68] sm:$0xff]  ;;  %v102_v41 = vld [vmem:[#allocation2 + $0x78] sm:$0xff] }
  0x21   :  { %v109_v39 = vpack.c.bf16 %v101_v37, %v99_v36  ;;  %v110_v42 = vpack.c.bf16 %v102_v41, %v100_v40  ;;  %v571_v43 = vld [vmem:[#allocation8 + $0x20] sm:$0xff]  ;;  %v570_v44 = vld [vmem:[#allocation8 + $0x18] sm:$0xff]  ;;  %v569_v45 = vld [vmem:[#allocation8 + $0x10] sm:$0xff] }
  0x22   :  { %246 = vmatpush.bf16.msra.mxu0 %v555_v6  ;;  %578 = vmatpush.bf16.msra.mxu3 %v555_v6  ;;  %v568_v46 = vld [vmem:[#allocation8 + $0x8] sm:$0xff]  ;;  %v567_v47 = vld [vmem:[#allocation8] sm:$0xff]  ;;  %v315_v41 = vld [vmem:[#allocation7 + $0x30] sm:$0xff] }
  0x23   :  { %275 = vmatpush.bf16.msra.mxu1 %v563_v7  ;;  %398 = vmatpush.bf16.msra.mxu2 %v573_v32  ;;  %v594_v48 = vld [vmem:[%s799_s2] ss:$0 sm:$0xff]  ;;  %v310_v60 = vld [vmem:[#allocation7 + $0x8] sm:$0xff] }
  0x24   :  { %v309_v59 = vld [vmem:[#allocation7] sm:$0xff] }
  0x25   :  { %v313_v27 = vld [vmem:[#allocation7 + $0x20] sm:$0xff] }
  0x26   :  { %247 = vmatpush.bf16.msra.mxu0 %v554_v8  ;;  %579 = vmatpush.bf16.msra.mxu3 %v554_v8 }
  0x27   :  { %276 = vmatpush.bf16.msra.mxu1 %v562_v9  ;;  %399 = vmatpush.bf16.msra.mxu2 %v572_v33  ;;  %v312_v9 = vld [vmem:[#allocation7 + $0x18] sm:$0xff] }
  0x2a   :  { %248 = vmatpush.bf16.msra.mxu0 %v553_v10  ;;  %580 = vmatpush.bf16.msra.mxu3 %v553_v10 }
  0x2b   :  { %277 = vmatpush.bf16.msra.mxu1 %v561_v11  ;;  %400 = vmatpush.bf16.msra.mxu2 %v571_v43 }
  0x2e   :  { %249 = vmatpush.bf16.msra.mxu0 %v552_v12  ;;  %581 = vmatpush.bf16.msra.mxu3 %v552_v12  ;;  %v311_v12 = vld [vmem:[#allocation7 + $0x10] sm:$0xff] }
  0x2f   :  { %278 = vmatpush.bf16.msra.mxu1 %v560_v13  ;;  %401 = vmatpush.bf16.msra.mxu2 %v570_v44 }
  0x32   :  { %250 = vmatpush.bf16.msra.mxu0 %v551_v14  ;;  %582 = vmatpush.bf16.msra.mxu3 %v551_v14 }
  0x33   :  { %279 = vmatpush.bf16.msra.mxu1 %v559_v15  ;;  %402 = vmatpush.bf16.msra.mxu2 %v569_v45  ;;  %v595_v45 = vld [vmem:[%s802_s5] ss:$0 sm:$0xff]  ;;  %s734_s5 = smov [#allocation10]  }
  0x34   :  { %s438_s22 = sshll.u32 %s734_s5, 4  ;;  %s439_s22 = int_to_ptr.vmem [resolvable:$true] %s438_s22 }
  0x35   :  { %251 = vmatmul.bf16.vlgmr.msra.gmra.mxu0 %v103_v22  ;;  %256 = vmatmul.bf16.vlgmr.msra.gmra.mxu3 %v105_v24  ;;  %v314_v24 = vld [vmem:[#allocation7 + $0x28] sm:$0xff] }
  0x36   :  { %280 = vmatmul.bf16.vlgmr.msra.gmra.mxu1 %v104_v23 }
  0x37   :  { %403 = vmatpush.bf16.msra.mxu2 %v568_v46 }
  0x3b   :  { %404 = vmatpush.bf16.msra.mxu2 %v567_v47 }
  0x45   :  { %261 = vmatmul.bf16.gmra.mxu3 %v107_v30 }
  0x46   :  { %285 = vmatmul.bf16.gmra.mxu1 %v106_v29 }
  0x55   :  { %266 = vmatmul.bf16.gmra.mxu3 %v109_v39 }
  0x56   :  { %290 = vmatmul.bf16.gmra.mxu1 %v108_v38  ;;  %v316_v38 = vld [vmem:[#allocation7 + $0x38] sm:$0xff] }
  0x66   :  { %295 = vmatmul.bf16.gmra.mxu1 %v110_v42 }
  0xb2   :  { %v252_v49 = vpop.f32.mrf.mxu0 }
  0xb3   :  { %v281_v50 = vpop.f32.mrf.mxu1  ;;  %v253_v51 = vadd.f32 %v594_v48, %v252_v49 }
  0xb5   :  { %v282_v52 = vadd.f32 %v281_v50, %v253_v51 }
  0xb7   :  { %v301_v57 = vmax.f32 %v282_v52, 0.0 }
  0xb8   :  { %v257_v53 = vpop.f32.mrf.mxu3 }
  0xb9   :  { %v317_v62 = vmul.f32 %v309_v59, %v301_v57  ;;  %v258_v3 = vadd.f32 %v594_v48, %v257_v53 }
  0xba   :  { %v254_v54 = vpop.f32.mrf.mxu0 }
  0xbb   :  { %v283_v55 = vpop.f32.mrf.mxu1  ;;  %v255_v56 = vadd.f32 %v594_v48, %v254_v54 }
  0xbd   :  { %v284_v58 = vadd.f32 %v283_v55, %v255_v56 }
  0xbf   :  { %v302_v61 = vmax.f32 %v284_v58, 0.0 }
  0xc0   :  { %v259_v0 = vpop.f32.mrf.mxu3 }
  0xc1   :  { %v318_v63 = vmul.f32 %v310_v60, %v302_v61  ;;  %v260_v4 = vadd.f32 %v594_v48, %v259_v0 }
  0xc3   :  { %v286_v1 = vpop.f32.mrf.mxu1  ;;  %v325_v2 = vpack.c.bf16 %v318_v63, %v317_v62 }
  0xc4   :  { %v287_v5 = vadd.f32 %v286_v1, %v258_v3 }
  0xc5   :  { %405 = vmatmul.bf16.vlgmr.msra.gmra.mxu2 %v325_v2 }
  0xc6   :  { %v303_v10 = vmax.f32 %v287_v5, 0.0 }
  0xc8   :  { %v262_v6 = vpop.f32.mrf.mxu3  ;;  %v319_v14 = vmul.f32 %v311_v12, %v303_v10 }
  0xc9   :  { %v263_v18 = vadd.f32 %v594_v48, %v262_v6 }
  0xcb   :  { %v288_v7 = vpop.f32.mrf.mxu1 }
  0xcc   :  { %v289_v8 = vadd.f32 %v288_v7, %v260_v4 }
  0xce   :  { %v304_v11 = vmax.f32 %v289_v8, 0.0 }
  0xd0   :  { %v320_v13 = vmul.f32 %v312_v9, %v304_v11  ;;  %v264_v15 = vpop.f32.mrf.mxu3 }
  0xd1   :  { %v265_v19 = vadd.f32 %v594_v48, %v264_v15 }
  0xd2   :  { %v326_v17 = vpack.c.bf16 %v320_v13, %v319_v14 }
  0xd3   :  { %v291_v16 = vpop.f32.mrf.mxu1 }
  0xd4   :  { %v292_v20 = vadd.f32 %v291_v16, %v263_v18 }
  0xd5   :  { %410 = vmatmul.bf16.gmra.mxu2 %v326_v17 }
  0xd6   :  { %v305_v25 = vmax.f32 %v292_v20, 0.0 }
  0xd8   :  { %v267_v23 = vpop.f32.mrf.mxu3  ;;  %v321_v29 = vmul.f32 %v313_v27, %v305_v25 }
  0xd9   :  { %v268_v32 = vadd.f32 %v594_v48, %v267_v23 }
  0xdb   :  { %v293_v21 = vpop.f32.mrf.mxu1 }
  0xdc   :  { %v294_v22 = vadd.f32 %v293_v21, %v265_v19 }
  0xde   :  { %v306_v26 = vmax.f32 %v294_v22, 0.0 }
  0xe0   :  { %v322_v28 = vmul.f32 %v314_v24, %v306_v26  ;;  %v269_v33 = vpop.f32.mrf.mxu3 }
  0xe1   :  { %v270_v34 = vadd.f32 %v594_v48, %v269_v33 }
  0xe2   :  { %v327_v31 = vpack.c.bf16 %v322_v28, %v321_v29 }
  0xe3   :  { %v296_v30 = vpop.f32.mrf.mxu1 }
  0xe4   :  { %v297_v35 = vadd.f32 %v296_v30, %v268_v32 }
  0xe5   :  { %415 = vmatmul.bf16.gmra.mxu2 %v327_v31 }
  0xe6   :  { %v307_v39 = vmax.f32 %v297_v35, 0.0 }
  0xe8   :  { %v323_v43 = vmul.f32 %v315_v41, %v307_v39 }
  0xeb   :  { %v298_v36 = vpop.f32.mrf.mxu1 }
  0xec   :  { %v299_v37 = vadd.f32 %v298_v36, %v270_v34 }
  0xee   :  { %v308_v40 = vmax.f32 %v299_v37, 0.0 }
  0xf0   :  { %v324_v42 = vmul.f32 %v316_v38, %v308_v40 }
  0xf2   :  { %v328_v44 = vpack.c.bf16 %v324_v42, %v323_v43 }
  0xf5   :  { %420 = vmatmul.bf16.gmra.mxu2 %v328_v44 }
 0x148   :  { %v406_v46 = vpop.f32.mrf.mxu2 }
 0x149   :  { %v407_v47 = vadd.f32 %v595_v45, %v406_v46 }
 0x14b   :  { %426 = vst [vmem:[#allocation10] sm:$0xff] %v407_v47 }
 0x150   :  { %v408_v49 = vpop.f32.mrf.mxu2 }
 0x151   :  { %v409_v48 = vadd.f32 %v595_v45, %v408_v49 }
 0x153   :  { %427 = vst [vmem:[#allocation10 + $0x8] sm:$0xff] %v409_v48 }
 0x158   :  { %v411_v50 = vpop.f32.mrf.mxu2 }
 0x159   :  { %v412_v51 = vadd.f32 %v595_v45, %v411_v50 }
 0x15b   :  { %428 = vst [vmem:[#allocation10 + $0x10] sm:$0xff] %v412_v51 }
 0x160   :  { %v413_v52 = vpop.f32.mrf.mxu2 }
 0x161   :  { %v414_v53 = vadd.f32 %v595_v45, %v413_v52 }
 0x163   :  { %429 = vst [vmem:[#allocation10 + $0x18] sm:$0xff] %v414_v53 }
 0x168   :  { %v416_v54 = vpop.f32.mrf.mxu2 }
 0x169   :  { %v417_v55 = vadd.f32 %v595_v45, %v416_v54 }
 0x16b   :  { %430 = vst [vmem:[#allocation10 + $0x20] sm:$0xff] %v417_v55 }
 0x170   :  { %v418_v56 = vpop.f32.mrf.mxu2 }
 0x171   :  { %v419_v57 = vadd.f32 %v595_v45, %v418_v56 }
 0x173   :  { %431 = vst [vmem:[#allocation10 + $0x28] sm:$0xff] %v419_v57 }
 0x178   :  { %v421_v58 = vpop.f32.mrf.mxu2 }
 0x179   :  { %v422_v59 = vadd.f32 %v595_v45, %v421_v58 }
 0x17b   :  { %432 = vst [vmem:[#allocation10 + $0x30] sm:$0xff] %v422_v59 }
 0x180   :  { %v423_v60 = vpop.f32.mrf.mxu2 }
 0x181   :  { %v424_v61 = vadd.f32 %v595_v45, %v423_v60 }
 0x183   :  { %433 = vst [vmem:[#allocation10 + $0x38] sm:$0xff] %v424_v61 }
 0x184   :  { %446 = dma.vmem_to_hbm [thread:$0]  %s439_s22, 1024, %s441_s25, [#allocation4], %s731_s17, %s731_s17, %s732_s18  }
 0x185   :  { %722 = dma.done.wait [#allocation4], 1024  }
 0x186   :  { %723 = vsyncadd [#allocation4], 4294966272 }
 0x187   :  { %451 = vsyncpa [#allocation3], 1 }
 0x188   :  { %452 = vsyncpa [#allocation6], 1 }
 0x189   :  { %453 = vsyncpa [#allocation9], 1 }
 0x18a   :  { %454 = vsyncpa [#allocation4], 1 }

</bundles_post_ra>
